<compile_context>
chip_gen: v5e
topology: v5e:2x2
jax: 0.10.0
libtpu: 0.0.40
codegen_flags: <defaults>
</compile_context>

<pallas_src>
import functools

import jax
import jax.numpy as jnp
from jax.experimental import pallas as pl
from jax.experimental.pallas import tpu as pltpu


def _rgcn_kernel(x_ref, feat_ref, adj_ref,
                 wfx_ref, wff_ref, b_ref, g_ref, be_ref, wr_ref,
                 o_ref, *, batch_tile, node_num, relation_num):
    Bt, N, R = batch_tile, node_num, relation_num
    H = wfx_ref.shape[-1]
    mm_dtype = wfx_ref.dtype          # bf16 in the fast path, f32 in the exact path

    x = x_ref[...]                    # [Bt*N, H]   (mm_dtype)
    feat = feat_ref[...]              # [Bt*N, 2]   (f32)

    # --- fc: Linear(H+2 -> H). x-part on the MXU; feature-part as two rank-1
    # VPU updates in f32 (a K=2 MXU matmul would be pure waste).
    h = jnp.dot(x.astype(mm_dtype), wr := None or wfx_ref[...],
                preferred_element_type=jnp.float32)                    # [Bt*N, H]
    wff = wff_ref[...]
    h = h + feat[:, 0:1] * wff[0:1, :] + feat[:, 1:2] * wff[1:2, :]
    h = h + b_ref[...]

    # --- LayerNorm over hidden (eps = 1e-5, PyTorch default), then tanh. f32.
    mu = jnp.mean(h, axis=-1, keepdims=True)
    var = jnp.mean((h - mu) * (h - mu), axis=-1, keepdims=True)
    h = (h - mu) * jax.lax.rsqrt(var + 1e-5)
    h = h * g_ref[...] + be_ref[...]
    h = jnp.tanh(h)                                                    # [Bt*N, H] f32

    # --- relational message passing.
    # All R neighbour aggregations in ONE batched matmul (bf16 operands, f32 acc):
    #   [Bt, R*N, N] @ [Bt, N, H] -> [Bt, R*N, H]
    h3 = h.reshape(Bt, N, H)                  # leading-dim split (N % 8 == 0)
    adj = adj_ref[...]                        # [Bt, R*N, N]
    s = jnp.einsum('bmn,bnh->bmh', adj.astype(mm_dtype), h3.astype(mm_dtype),
                   preferred_element_type=jnp.float32)                 # [Bt, R*N, H]

    # Pack supports along lanes: [h | A_1 h | ... | A_R h]  ->  K = (R+1)*H = 128.
    parts = [h3] + [s[:, r * N:(r + 1) * N, :] for r in range(R)]
    supports = jnp.concatenate(parts, axis=-1)                         # [Bt, N, (R+1)*H]
    supports = supports.reshape(Bt * N, (R + 1) * H)

    # Single fused relational projection on the MXU (K = (R+1)*H, shared weights).
    acc = jnp.dot(supports.astype(mm_dtype), wr_ref[...],
                  preferred_element_type=jnp.float32)                  # [Bt*N, H]

    # residual with the (post-norm, post-tanh) f32 h
    o_ref[...] = (acc + h).astype(o_ref.dtype)


def _round_up(v, m):
    return (v + m - 1) // m * m


def _tile_vmem_bytes(Bt, N, R, H):
    """Padding-aware per-step VMEM footprint (f32-conservative).

    Accounts for the (8, 128) VMEM tiling: the adj block's last dim (N=16) and
    the H=32 / feature=2 blocks are all padded to 128 lanes in VMEM.
    """
    lanes = 128
    rows_xo = _round_up(Bt * N, 8)
    rows_adj = _round_up(Bt * R * N, 8)
    x_b = rows_xo * _round_up(H, lanes) * 4
    f_b = rows_xo * _round_up(2, lanes) * 4
    a_b = rows_adj * _round_up(N, lanes) * 4
    o_b = rows_xo * _round_up(H, lanes) * 4
    per_buffer = x_b + f_b + a_b + o_b
    # double-buffered pipeline I/O + in-kernel f32 temporaries (h, s, supports, acc)
    temps = 8 * rows_xo * lanes * 4 + rows_adj * lanes * 4
    weights = 4 * ((R + 2) * H * H + 8 * H) * 4
    return 2 * per_buffer + temps + weights


def _pick_batch_tile(B, N, R, H, *, target_rows=1024,
                     vmem_budget_bytes=12 * 1024 * 1024):
    """Largest tile with ~target_rows rows that fits VMEM; keeps grid >= 2."""
    cap = max(1, (B + 1) // 2)        # >= 2 grid steps when B >= 2 (v7x: 2 TCs)
    best = 1
    for cand in range(1, cap + 1):
        if cand * N > max(target_rows, N):
            break
        if _tile_vmem_bytes(cand, N, R, H) > vmem_budget_bytes:
            break
        best = cand
    # Prefer a divisor of B (no batch padding) if one exists close to `best`;
    # otherwise keep `best` and pad the batch (handles prime B).
    for d in range(best, 0, -1):
        if B % d == 0:
            if d * 2 >= best:
                return d
            break
    return best


def rgcn_layer_forward(inputs, params, *, batch_tile=None,
                       compute_dtype=jnp.bfloat16):
    """inputs: dict with 'x' [B,N,H], 'feature' [B,N,2], 'adj' [B,R,N,N]."""
    x, feature, adj = inputs['x'], inputs['feature'], inputs['adj']
    B, N, H = x.shape
    R = adj.shape[1]
    assert N % 8 == 0, "node_num must be a multiple of 8 (sublane tiling)"

    Bt = _pick_batch_tile(B, N, R, H) if batch_tile is None else batch_tile
    Bp = -(-B // Bt) * Bt                      # pad batch to a multiple of Bt
    grid = Bp // Bt

    fc_w, fc_b = params['fc_w'], params['fc_b']          # [H, H+2], [H]
    gamma, beta = params['ln_gamma'], params['ln_beta']  # [H], [H]
    W, a = params['W'], params['a']                      # [H, V, H], [R+1, V]

    mm = compute_dtype

    # Parameter-only setup (glue): torch.matmul(a, W).permute(1, 0, 2),
    # flattened so the in-kernel relational projection is ONE matmul.
    Wr_flat = jnp.einsum('rv,hvk->rhk', a, W).reshape((R + 1) * H, H).astype(mm)

    # Split the fc weight (Linear stores [out, in]) into x-part / feature-part,
    # transposed to [in, out] for right-multiplication.
    wfx = fc_w[:, :H].T.astype(mm)                       # [H, H]   (MXU operand)
    wff = fc_w[:, H:].T.astype(jnp.float32)              # [2, H]   (VPU rank-1)
    b2 = fc_b.reshape(1, H).astype(jnp.float32)
    g2 = gamma.reshape(1, H).astype(jnp.float32)
    be2 = beta.reshape(1, H).astype(jnp.float32)

    # Zero-pad the batch if needed (padded rows flow through harmlessly and are
    # sliced off at the end).
    if Bp != B:
        pad = Bp - B
        x_p = jnp.pad(x, ((0, pad), (0, 0), (0, 0)))
        f_p = jnp.pad(feature, ((0, pad), (0, 0), (0, 0)))
        adj_p = jnp.pad(adj, ((0, pad), (0, 0), (0, 0), (0, 0)))
    else:
        x_p, f_p, adj_p = x, feature, adj

    # Present x / feature / out flattened to [Bp*N, ...] so each grid step works
    # on a [Bt*N, H] tile; adj as [Bp, R*N, N] (contiguous per-tile HBM slab).
    x_flat = x_p.astype(mm).reshape(Bp * N, H)
    f_flat = f_p.astype(jnp.float32).reshape(Bp * N, 2)
    adj_in = adj_p.astype(mm).reshape(Bp, R * N, N)

    # VMEM limit from the real (padding-aware) footprint, capped at 32 MiB so
    # v7x (64 MiB physical VMEM) keeps headroom for compiler scratch.
    est = _tile_vmem_bytes(Bt, N, R, H)
    vmem_limit = int(min(32 * 1024 * 1024, max(4 * 1024 * 1024, 2 * est)))

    kernel = functools.partial(_rgcn_kernel,
                               batch_tile=Bt, node_num=N, relation_num=R)

    out_flat = pl.pallas_call(
        kernel,
        out_shape=jax.ShapeDtypeStruct((Bp * N, H), x.dtype),
        grid_spec=pltpu.PrefetchScalarGridSpec(
            num_scalar_prefetch=0,
            grid=(grid,),
            in_specs=[
                pl.BlockSpec((Bt * N, H), lambda b: (b, 0)),          # x (flattened)
                pl.BlockSpec((Bt * N, 2), lambda b: (b, 0)),          # feature
                pl.BlockSpec((Bt, R * N, N), lambda b: (b, 0, 0)),    # adj
                pl.BlockSpec((H, H), lambda b: (0, 0)),               # wfx
                pl.BlockSpec((2, H), lambda b: (0, 0)),               # wff
                pl.BlockSpec((1, H), lambda b: (0, 0)),               # fc bias
                pl.BlockSpec((1, H), lambda b: (0, 0)),               # ln gamma
                pl.BlockSpec((1, H), lambda b: (0, 0)),               # ln beta
                pl.BlockSpec(((R + 1) * H, H), lambda b: (0, 0)),     # Wr (fused)
            ],
            out_specs=pl.BlockSpec((Bt * N, H), lambda b: (b, 0)),
        ),
        compiler_params=pltpu.CompilerParams(
            dimension_semantics=("parallel",),
            vmem_limit_bytes=vmem_limit),
    )(x_flat, f_flat, adj_in, wfx, wff, b2, g2, be2, Wr_flat)

    out = out_flat.reshape(Bp, N, H)[:B]
    return {'x': out, 'feature': feature, 'adj': adj}


def _reference_forward(inputs, params):
    """Pure-JAX reference mirroring the PyTorch module (dropout = identity)."""
    x, feature, adj = inputs['x'], inputs['feature'], inputs['adj']
    B, N, H = x.shape
    R = adj.shape[1]
    xf = jnp.concatenate([x, feature], axis=2)
    h = xf @ params['fc_w'].T + params['fc_b']
    mu = jnp.mean(h, axis=-1, keepdims=True)
    var = jnp.mean((h - mu) ** 2, axis=-1, keepdims=True)
    h = (h - mu) / jnp.sqrt(var + 1e-5) * params['ln_gamma'] + params['ln_beta']
    h = jnp.tanh(h)
    eye = jnp.broadcast_to(jnp.eye(N, dtype=x.dtype), (B, N, N))
    adjs = [eye] + [adj[:, i] for i in range(R)]
    supports = jnp.stack([jnp.einsum('bij,bjh->bih', A, h) for A in adjs], axis=1)
    Wmix = jnp.einsum('rv,hvk->rhk', params['a'], params['W'])
    out = jnp.einsum('brnh,rhk->bnk', supports, Wmix)
    return out + h


def _xavier_normal(key, shape):
    # matches nn.init.xavier_normal_ fan computation for these tensors
    if len(shape) == 2:
        fan_in, fan_out = shape[1], shape[0]
    else:  # [H, V, H]: fan_in = shape[1]*recept, fan_out = shape[0]*recept
        receptive = 1
        for s in shape[2:]:
            receptive *= s
        fan_in, fan_out = shape[1] * receptive, shape[0] * receptive
    std = (2.0 / (fan_in + fan_out)) ** 0.5
    return std * jax.random.normal(key, shape, dtype=jnp.float32)


if __name__ == "__main__":
    B, N, H, R, V = 2, 16, 32, 3, 4

    key = jax.random.PRNGKey(0)
    ks = jax.random.split(key, 8)

    params = {
        'fc_w': 0.1 * jax.random.normal(ks[0], (H, H + 2), dtype=jnp.float32),
        'fc_b': 0.1 * jax.random.normal(ks[1], (H,), dtype=jnp.float32),
        'ln_gamma': jnp.ones((H,), dtype=jnp.float32),
        'ln_beta': jnp.zeros((H,), dtype=jnp.float32),
        'W': _xavier_normal(ks[2], (H, V, H)),
        'a': _xavier_normal(ks[3], (R + 1, V)),
    }

    inputs = {
        'x': jax.random.normal(ks[4], (B, N, H), dtype=jnp.float32),
        'feature': jax.random.normal(ks[5], (B, N, 2), dtype=jnp.float32),
        'adj': jax.random.uniform(ks[6], (B, R, N, N), dtype=jnp.float32),
    }

    ref = _reference_forward(inputs, params)

    # Exact-semantics path (f32 MXU operands) -- tight tolerance.
    out_f32 = rgcn_layer_forward(inputs, params, compute_dtype=jnp.float32)
    jax.block_until_ready(out_f32['x'])
    assert jnp.allclose(out_f32['x'], ref, atol=1e-4, rtol=1e-4), "f32 mismatch"

    # Performance path (bf16 MXU operands, f32 accumulation) -- bf16 tolerance.
    out_bf16 = rgcn_layer_forward(inputs, params)
    jax.block_until_ready(out_bf16['x'])
    assert jnp.allclose(out_bf16['x'], ref, atol=1e-1, rtol=1e-1), "bf16 mismatch"

    print("KERNEL_OK")
</pallas_src>

<mosaic_0001>
module attributes {stable_mosaic.version = 11 : i64} {
  func.func @_rgcn_kernel(%arg0: i32, %arg1: memref<16x32xf32, #tpu.memory_space<vmem>>, %arg2: memref<16x2xf32, #tpu.memory_space<vmem>>, %arg3: memref<1x48x16xf32, #tpu.memory_space<vmem>>, %arg4: memref<32x32xf32, #tpu.memory_space<vmem>>, %arg5: memref<2x32xf32, #tpu.memory_space<vmem>>, %arg6: memref<1x32xf32, #tpu.memory_space<vmem>>, %arg7: memref<1x32xf32, #tpu.memory_space<vmem>>, %arg8: memref<1x32xf32, #tpu.memory_space<vmem>>, %arg9: memref<128x32xf32, #tpu.memory_space<vmem>>, %arg10: memref<16x32xf32, #tpu.memory_space<vmem>>) attributes {dimension_semantics = [#tpu.dimension_semantics<parallel>], iteration_bounds = array<i64: 2>, scalar_prefetch = 0 : i64, scratch_operands = 0 : i64, tpu.core_type = #tpu.core_type<tc>, window_params = [{transform_indices = @transform_0, window_bounds = array<i64: 16, 32>}, {transform_indices = @transform_1, window_bounds = array<i64: 16, 2>}, {transform_indices = @transform_2, window_bounds = array<i64: 1, 48, 16>}, {pipeline_mode = #tpu.pipeline_mode<synchronous>, transform_indices = @transform_3, window_bounds = array<i64: 32, 32>}, {pipeline_mode = #tpu.pipeline_mode<synchronous>, transform_indices = @transform_4, window_bounds = array<i64: 2, 32>}, {pipeline_mode = #tpu.pipeline_mode<synchronous>, transform_indices = @transform_5, window_bounds = array<i64: 1, 32>}, {pipeline_mode = #tpu.pipeline_mode<synchronous>, transform_indices = @transform_6, window_bounds = array<i64: 1, 32>}, {pipeline_mode = #tpu.pipeline_mode<synchronous>, transform_indices = @transform_7, window_bounds = array<i64: 1, 32>}, {pipeline_mode = #tpu.pipeline_mode<synchronous>, transform_indices = @transform_8, window_bounds = array<i64: 128, 32>}, {transform_indices = @transform_9, window_bounds = array<i64: 16, 32>}]} {
    %c0 = arith.constant 0 : index
    %c0_0 = arith.constant 0 : index
    %0 = vector.load %arg1[%c0, %c0_0] : memref<16x32xf32, #tpu.memory_space<vmem>>, vector<16x32xf32>
    %c0_1 = arith.constant 0 : index
    %c0_2 = arith.constant 0 : index
    %1 = vector.load %arg2[%c0_1, %c0_2] : memref<16x2xf32, #tpu.memory_space<vmem>>, vector<16x2xf32>
    %c0_3 = arith.constant 0 : index
    %c0_4 = arith.constant 0 : index
    %2 = vector.load %arg4[%c0_3, %c0_4] : memref<32x32xf32, #tpu.memory_space<vmem>>, vector<32x32xf32>
    %cst = arith.constant dense<0.000000e+00> : vector<16x32xf32>
    %3 = tpu.matmul %0, %2, %cst {dimension_numbers = #tpu.dot_dimension_numbers<[1], [0], [0], [1], [0, 0, 1, 1], [], []>} : vector<16x32xf32>, vector<32x32xf32>, vector<16x32xf32> -> vector<16x32xf32>
    %c0_5 = arith.constant 0 : index
    %c0_6 = arith.constant 0 : index
    %4 = vector.load %arg5[%c0_5, %c0_6] : memref<2x32xf32, #tpu.memory_space<vmem>>, vector<2x32xf32>
    %5 = vector.extract_strided_slice %1 {offsets = [0, 0], sizes = [16, 1], strides = [1, 1]} : vector<16x2xf32> to vector<16x1xf32>
    %6 = vector.extract_strided_slice %4 {offsets = [0, 0], sizes = [1, 32], strides = [1, 1]} : vector<2x32xf32> to vector<1x32xf32>
    %7 = vector.broadcast %5 : vector<16x1xf32> to vector<16x32xf32>
    %8 = vector.broadcast %6 : vector<1x32xf32> to vector<16x32xf32>
    %9 = arith.mulf %7, %8 : vector<16x32xf32>
    %10 = arith.addf %3, %9 : vector<16x32xf32>
    %11 = vector.extract_strided_slice %1 {offsets = [0, 1], sizes = [16, 1], strides = [1, 1]} : vector<16x2xf32> to vector<16x1xf32>
    %12 = vector.extract_strided_slice %4 {offsets = [1, 0], sizes = [1, 32], strides = [1, 1]} : vector<2x32xf32> to vector<1x32xf32>
    %13 = vector.broadcast %11 : vector<16x1xf32> to vector<16x32xf32>
    %14 = vector.broadcast %12 : vector<1x32xf32> to vector<16x32xf32>
    %15 = arith.mulf %13, %14 : vector<16x32xf32>
    %16 = arith.addf %10, %15 : vector<16x32xf32>
    %c0_7 = arith.constant 0 : index
    %c0_8 = arith.constant 0 : index
    %17 = vector.load %arg6[%c0_7, %c0_8] : memref<1x32xf32, #tpu.memory_space<vmem>>, vector<1x32xf32>
    %18 = vector.broadcast %17 : vector<1x32xf32> to vector<16x32xf32>
    %19 = arith.addf %16, %18 : vector<16x32xf32>
    %cst_9 = arith.constant dense<0.000000e+00> : vector<16xf32>
    %20 = vector.multi_reduction <add>, %19, %cst_9 [1] : vector<16x32xf32> to vector<16xf32>
    %21 = vector.shape_cast %20 : vector<16xf32> to vector<16x1xf32>
    %cst_10 = arith.constant 3.200000e+01 : f32
    %22 = vector.broadcast %cst_10 : f32 to vector<16x1xf32>
    %23 = arith.divf %21, %22 : vector<16x1xf32>
    %24 = vector.broadcast %23 : vector<16x1xf32> to vector<16x32xf32>
    %25 = arith.subf %19, %24 : vector<16x32xf32>
    %26 = vector.broadcast %23 : vector<16x1xf32> to vector<16x32xf32>
    %27 = arith.subf %19, %26 : vector<16x32xf32>
    %28 = arith.mulf %25, %27 : vector<16x32xf32>
    %cst_11 = arith.constant dense<0.000000e+00> : vector<16xf32>
    %29 = vector.multi_reduction <add>, %28, %cst_11 [1] : vector<16x32xf32> to vector<16xf32>
    %30 = vector.shape_cast %29 : vector<16xf32> to vector<16x1xf32>
    %cst_12 = arith.constant 3.200000e+01 : f32
    %31 = vector.broadcast %cst_12 : f32 to vector<16x1xf32>
    %32 = arith.divf %30, %31 : vector<16x1xf32>
    %33 = vector.broadcast %23 : vector<16x1xf32> to vector<16x32xf32>
    %34 = arith.subf %19, %33 : vector<16x32xf32>
    %cst_13 = arith.constant 9.99999974E-6 : f32
    %35 = vector.broadcast %cst_13 : f32 to vector<16x1xf32>
    %36 = arith.addf %32, %35 : vector<16x1xf32>
    %37 = math.rsqrt %36 : vector<16x1xf32>
    %38 = vector.broadcast %37 : vector<16x1xf32> to vector<16x32xf32>
    %39 = arith.mulf %34, %38 : vector<16x32xf32>
    %c0_14 = arith.constant 0 : index
    %c0_15 = arith.constant 0 : index
    %40 = vector.load %arg7[%c0_14, %c0_15] : memref<1x32xf32, #tpu.memory_space<vmem>>, vector<1x32xf32>
    %41 = vector.broadcast %40 : vector<1x32xf32> to vector<16x32xf32>
    %42 = arith.mulf %39, %41 : vector<16x32xf32>
    %c0_16 = arith.constant 0 : index
    %c0_17 = arith.constant 0 : index
    %43 = vector.load %arg8[%c0_16, %c0_17] : memref<1x32xf32, #tpu.memory_space<vmem>>, vector<1x32xf32>
    %44 = vector.broadcast %43 : vector<1x32xf32> to vector<16x32xf32>
    %45 = arith.addf %42, %44 : vector<16x32xf32>
    %46 = math.tanh %45 : vector<16x32xf32>
    %47 = vector.shape_cast %46 : vector<16x32xf32> to vector<1x16x32xf32>
    %c0_18 = arith.constant 0 : index
    %c0_19 = arith.constant 0 : index
    %c0_20 = arith.constant 0 : index
    %48 = vector.load %arg3[%c0_18, %c0_19, %c0_20] : memref<1x48x16xf32, #tpu.memory_space<vmem>>, vector<1x48x16xf32>
    "tpu.trace_start"() <{level = 10 : i32, message = "bmn,bnh->bmh"}> : () -> ()
    %cst_21 = arith.constant dense<0.000000e+00> : vector<1x48x32xf32>
    %49 = tpu.matmul %48, %47, %cst_21 {dimension_numbers = #tpu.dot_dimension_numbers<[2], [1], [1], [2], [0, 0, 0, 1, 1, 2], [0], [0]>} : vector<1x48x16xf32>, vector<1x16x32xf32>, vector<1x48x32xf32> -> vector<1x48x32xf32>
    "tpu.trace_stop"() : () -> ()
    %50 = vector.extract_strided_slice %49 {offsets = [0, 0, 0], sizes = [1, 16, 32], strides = [1, 1, 1]} : vector<1x48x32xf32> to vector<1x16x32xf32>
    %51 = vector.extract_strided_slice %49 {offsets = [0, 16, 0], sizes = [1, 16, 32], strides = [1, 1, 1]} : vector<1x48x32xf32> to vector<1x16x32xf32>
    %52 = vector.extract_strided_slice %49 {offsets = [0, 32, 0], sizes = [1, 16, 32], strides = [1, 1, 1]} : vector<1x48x32xf32> to vector<1x16x32xf32>
    %53 = tpu.concatenate %47, %50, %51, %52 in 2 : vector<1x16x32xf32>, vector<1x16x32xf32>, vector<1x16x32xf32>, vector<1x16x32xf32> -> vector<1x16x128xf32>
    %54 = vector.shape_cast %53 : vector<1x16x128xf32> to vector<16x128xf32>
    %c0_22 = arith.constant 0 : index
    %c0_23 = arith.constant 0 : index
    %55 = vector.load %arg9[%c0_22, %c0_23] : memref<128x32xf32, #tpu.memory_space<vmem>>, vector<128x32xf32>
    %cst_24 = arith.constant dense<0.000000e+00> : vector<16x32xf32>
    %56 = tpu.matmul %54, %55, %cst_24 {dimension_numbers = #tpu.dot_dimension_numbers<[1], [0], [0], [1], [0, 0, 1, 1], [], []>} : vector<16x128xf32>, vector<128x32xf32>, vector<16x32xf32> -> vector<16x32xf32>
    %57 = arith.addf %56, %46 : vector<16x32xf32>
    %c0_25 = arith.constant 0 : index
    %c0_26 = arith.constant 0 : index
    %58 = vector.load %arg10[%c0_25, %c0_26] : memref<16x32xf32, #tpu.memory_space<vmem>>, vector<16x32xf32>
    tpu.vector_store %arg10[%c0_25, %c0_26], %57 {strides = array<i32>} : memref<16x32xf32, #tpu.memory_space<vmem>>, vector<16x32xf32>,
    return
  }
  func.func @transform_0(%arg0: i32) -> (i32, i32) {
    %c0_i32 = arith.constant 0 : i32
    %c0_i32_0 = arith.constant 0 : i32
    return %arg0, %c0_i32 : i32, i32
  }
  func.func @transform_1(%arg0: i32) -> (i32, i32) {
    %c0_i32 = arith.constant 0 : i32
    %c0_i32_0 = arith.constant 0 : i32
    return %arg0, %c0_i32 : i32, i32
  }
  func.func @transform_2(%arg0: i32) -> (i32, i32, i32) {
    %c0_i32 = arith.constant 0 : i32
    %c0_i32_0 = arith.constant 0 : i32
    %c0_i32_1 = arith.constant 0 : i32
    return %arg0, %c0_i32, %c0_i32_0 : i32, i32, i32
  }
  func.func @transform_3(%arg0: i32) -> (i32, i32) {
    %c0_i32 = arith.constant 0 : i32
    %c0_i32_0 = arith.constant 0 : i32
    %c0_i32_1 = arith.constant 0 : i32
    return %c0_i32, %c0_i32_0 : i32, i32
  }
  func.func @transform_4(%arg0: i32) -> (i32, i32) {
    %c0_i32 = arith.constant 0 : i32
    %c0_i32_0 = arith.constant 0 : i32
    %c0_i32_1 = arith.constant 0 : i32
    return %c0_i32, %c0_i32_0 : i32, i32
  }
  func.func @transform_5(%arg0: i32) -> (i32, i32) {
    %c0_i32 = arith.constant 0 : i32
    %c0_i32_0 = arith.constant 0 : i32
    %c0_i32_1 = arith.constant 0 : i32
    return %c0_i32, %c0_i32_0 : i32, i32
  }
  func.func @transform_6(%arg0: i32) -> (i32, i32) {
    %c0_i32 = arith.constant 0 : i32
    %c0_i32_0 = arith.constant 0 : i32
    %c0_i32_1 = arith.constant 0 : i32
    return %c0_i32, %c0_i32_0 : i32, i32
  }
  func.func @transform_7(%arg0: i32) -> (i32, i32) {
    %c0_i32 = arith.constant 0 : i32
    %c0_i32_0 = arith.constant 0 : i32
    %c0_i32_1 = arith.constant 0 : i32
    return %c0_i32, %c0_i32_0 : i32, i32
  }
  func.func @transform_8(%arg0: i32) -> (i32, i32) {
    %c0_i32 = arith.constant 0 : i32
    %c0_i32_0 = arith.constant 0 : i32
    %c0_i32_1 = arith.constant 0 : i32
    return %c0_i32, %c0_i32_0 : i32, i32
  }
  func.func @transform_9(%arg0: i32) -> (i32, i32) {
    %c0_i32 = arith.constant 0 : i32
    %c0_i32_0 = arith.constant 0 : i32
    return %arg0, %c0_i32 : i32, i32
  }
}

</mosaic_0001>

<bundles_post_ra>
// kernel: tpu_custom_call.1
= control target key start
LH: loop header
LB: loop body
LE: loop exit
PB: predicated region body
PF: predicated region fallthrough
CT: control target
= control target key end

     0   :  { %14 = vsyncpa [#allocation3], 0  ;;  %s1176_s0 = inlined_call_operand.vmem [shape: f32[32,32], index: 0, kind: input, shape index: {}]   ;;  %s1177_s1 = inlined_call_operand.vmem [shape: f32[32,2], index: 1, kind: input, shape index: {}]   ;;  %s1178_s2 = inlined_call_operand.vmem [shape: f32[2,48,16], index: 2, kind: input, shape index: {}]   ;;  %s1179_s3 = inlined_call_operand.vmem [shape: f32[32,32], index: 3, kind: input, shape index: {}]   ;;  %s1180_s4 = inlined_call_operand.vmem [shape: f32[2,32], index: 4, kind: input, shape index: {}]   ;;  %s1181_s5 = inlined_call_operand.vmem [shape: f32[1,32], index: 5, kind: input, shape index: {}]   ;;  %s1182_s6 = inlined_call_operand.vmem [shape: f32[1,32], index: 6, kind: input, shape index: {}]   ;;  %s1183_s7 = inlined_call_operand.vmem [shape: f32[1,32], index: 7, kind: input, shape index: {}]   ;;  %s1184_s8 = inlined_call_operand.vmem [shape: f32[128,32], index: 8, kind: input, shape index: {}]   ;;  %s1185_s9 = inlined_call_operand.hbm [shape: f32[32,32], index: 9, kind: output, shape index: {}]  }
   0x1   :  { %16 = vsyncpa [#allocation3 + $0x1], 0  ;;  %s990_s30 = smov 0   ;;  %s992_s10 = smov 0  }
   0x2   :  { %s994_s11 = smov 0   ;;  %s996_s12 = smov 0  }
   0x3 LB: > { %s1011_s13 = sadd.s32 4294967295, %s930_s12   ;;  %s747_s14 = sadd.s32 4294967294, %s930_s12   ;;  %s930_s12 = sphi %s996_s12, %s1191_s12   ;;  %s926_s11 = sphi %s994_s11, %s1190_s11   ;;  %s922_s10 = sphi %s992_s10, %s1189_s10   ;;  %s918_s30 = sphi %s990_s30, %s1188_s30  }
   0x4   : > { %s1015_s15 = sadd.s32 1, %s930_s12   ;;  %s233_s16 = sadd.s32 1, %s926_s11 }
   0x5   : > { %s230_s17 = ssub.s32 %s930_s12, %s1015_s15  ;;  %p243_p0 = scmp.ne.s32.totalorder %s926_s11, %s922_s10 }
   0x6   : > { %p231_p1 = scmp.eq.s32.totalorder %s230_s17, 0  ;;  %p244_p2 = scmp.eq.s32.totalorder %s1011_s13, 1 }
   0x7   : > { %p249_p3 = scmp.ne.s32.totalorder %s922_s10, %s918_s30  ;;  %p250_p4 = scmp.eq.s32.totalorder %s747_s14, 1 }
   0x8   : > { %s1026_s18 = scalar_select %p231_p1, %s926_s11, %s233_s16  }
   0x9   : > { %p1028_p5 = por %p244_p2, %p243_p0  ;;  %p1032_p6 = por %p250_p4, %p249_p3 }
   0xa   : > { %p750_p7 = scmp.ge.s32.totalorder %s930_s12, 1  ;;  %p312_p8 = scmp.lt.s32.totalorder %s930_s12, 3 }
   0xc   : > { %p313_p9 = pnand %p750_p7, %p312_p8 }
   0xd   : > { %s752_s25 = sshll.u32 (!%p313_p9), %s1011_s13, 1  ;;  %p370_p11 = scmp.lt.s32.totalorder (!%p313_p9), %s1011_s13, 1 }
   0xe   : > { %316 = sbr.rel (%p313_p9) target bundleno = 836 (0x344), region = 56  ;;  %p359_p10 = scmp.lt.s32.totalorder (!%p313_p9), %s752_s25, 3 }
   0xf   : > { %s935_s26 = smov (!%p313_p9), 32   ;;  %s936_s27 = smov (!%p313_p9), 64  }
  0x10   : > { %s937_s28 = smov (!%p313_p9), 96  }
  0x13   : > { %v383_v0 = vld [vmem:[%s1179_s3 + $0x18] sm:$0xff]  ;;  %v382_v1 = vld [vmem:[%s1179_s3 + $0x10] sm:$0xff]  ;;  %v932_v2 = vmov 0   ;;  %v381_v3 = vld [vmem:[%s1179_s3 + $0x8] sm:$0xff]  ;;  %v933_v4 = vmov 1   ;;  %s1193_s25 = smov (!%p359_p10, %s752_s25), 3 }
  0x14   : > { %417 = vmatpush.msra.mxu0 %v383_v0  ;;  %837 = vset.pattern.permute.xlu0 %v932_v2  ;;  %v380_v5 = vld [vmem:[%s1179_s3] sm:$0xff]  ;;  %s753_s14 = sshll.u32 %s1193_s25, 3  ;;  %vm398_vm0 = vcmask 261120   ;;  %v934_v32 = vmov 32.0   ;;  %vm518_vm8 = vcmask 130048   ;;  %vm598_vm9 = vcmask 523264  }
  0x15   : > { %838 = vset.pattern.permute.xlu1 %v933_v4  ;;  %s362_s21 = scalar_lea.vmem %s1176_s0, %s753_s14  ;;  %s368_s24 = scalar_lea.vmem %s1177_s1, %s753_s14  ;;  %v384_v12 = vld [vmem:[%s1180_s4] sm:$0x3]  ;;  %858 = vrcp.f32 %v934_v32  ;;  %vm601_vm10 = vcmask 785408  }
  0x16   : > { %418 = vmatpush.msra.mxu0 %v382_v1  ;;  %v376_v6 = vld [vmem:[%s362_s21] sm:$0xff]  ;;  %v379_v7 = vld [vmem:[%s368_s24 + $0x8] sm:$0xff]  ;;  %v395_v14 = vperm.slane %v384_v12, 0  ;;  %v436_v17 = vperm.slane %v384_v12, 1 }
  0x17   : > { %392 = vperm.xlu0 %837, %v379_v7   ;;  %433 = vperm.xlu1 %838, %v379_v7   ;;  %v377_v8 = vld [vmem:[%s362_s21 + $0x8] sm:$0xff]  ;;  %v378_v9 = vld [vmem:[%s368_s24] sm:$0xff]  ;;  %s371_s21 = scalar_select %p370_p11, %s1011_s13, 1 }
  0x18   : > { %419 = vmatpush.msra.mxu0 %v381_v3  ;;  %v855_v26 = vld [vmem:[%s1181_s5] ss:$0 sm:$0xff] }
  0x19   : > { %v856_v63 = vld [vmem:[%s1182_s6] ss:$0 sm:$0xff]  ;;  %s789_s22 = smul.u32 48, %s371_s21 }
  0x1a   : > { %420 = vmatpush.msra.mxu0 %v380_v5  ;;  %v857_v2 = vld [vmem:[%s1183_s7] ss:$0 sm:$0xff] }
  0x1b   : > { %757 = vmatmul.msk.f32.vlgmr.msra.gmra.mxu0 %vm398_vm0, %v376_v6  ;;  %v859_v33 = vpop.eup %858  ;;  %s374_s25 = scalar_lea.vmem %s1178_s2, %s789_s22 }
  0x1c   : > { %v454_v34 = vmul.f32 32.0, %v859_v33  ;;  %vm458_vm1 = vweird.f32 %v859_v33 }
  0x1e   : > { %v455_v35 = vsub.f32 1.0, %v454_v34 }
  0x1f   : > { %387 = vperm.xlu0 %837, %v378_v9   ;;  %429 = vperm.xlu1 %838, %v378_v9  }
  0x20   : > { %v456_v36 = vmul.f32 %v859_v33, %v455_v35 }
  0x22   : > { %v457_v37 = vadd.f32 %v859_v33, %v456_v36  ;;  %v613_v36 = vld [vmem:[%s1184_s8 + $0x48] sm:$0xff] }
  0x23   : > { %758 = vmatmul.msk.f32.gmra.mxu0 %vm398_vm0, %v377_v8 }
  0x24   : > { %v459_v38 = vsel %vm458_vm1, %v859_v33, %v457_v37  ;;  %v612_v37 = vld [vmem:[%s1184_s8 + $0x40] sm:$0xff] }
  0x27   : > { %854 = vset.pattern.permute.xlu0 %v933_v4 }
  0x89   : > { %v393_v10 = vpop.permute.xlu0 %392  ;;  %v434_v11 = vpop.permute.xlu1 %433 }
  0x8a   : > { %v397_v16 = vmul.f32 %v395_v14, %v393_v10  ;;  %v438_v18 = vmul.f32 %v436_v17, %v434_v11 }
  0x91   : > { %v388_v15 = vpop.permute.xlu0 %387  ;;  %v430_v20 = vpop.permute.xlu1 %429 }
  0x92   : > { %v396_v19 = vmul.f32 %v395_v14, %v388_v15  ;;  %v437_v23 = vmul.f32 %v436_v17, %v430_v20  ;;  %v512_v14 = vld [vmem:[%s374_s25] sm:$0xff]  ;;  %v514_v15 = vld [vmem:[%s374_s25 + $0x10] sm:$0xff]  ;;  %v513_v17 = vld [vmem:[%s374_s25 + $0x8] sm:$0xff] }
  0x93   : > { %v517_v20 = vld [vmem:[%s374_s25 + $0x28] sm:$0xff] }
  0x98   : > { %v422_v13 = vpop.f32.mrf.mxu0 }
  0x99   : > { %v423_v24 = vadd.f32 %v422_v13, %v396_v19  ;;  %v516_v19 = vld [vmem:[%s374_s25 + $0x20] sm:$0xff] }
  0x9b   : > { %v439_v28 = vadd.f32 %v437_v23, %v423_v24  ;;  %v617_v23 = vld [vmem:[%s1184_s8 + $0x68] sm:$0xff]  ;;  %v616_v24 = vld [vmem:[%s1184_s8 + $0x60] sm:$0xff] }
  0x9d   : > { %v445_v30 = vadd.f32 %v855_v26, %v439_v28  ;;  %v614_v28 = vld [vmem:[%s1184_s8 + $0x50] sm:$0xff] }
  0x9f   : > { %v447_v31 = vsel %vm398_vm0, %v445_v30, 0.0 }
  0xa0   : > { %v425_v21 = vpop.f32.mrf.mxu0 }
  0xa1   : > { %v426_v22 = vadd.f32 %v425_v21, %v397_v16  ;;  %v619_v21 = vld [vmem:[%s1184_s8 + $0x78] sm:$0xff] }
  0xa2   : > { %620 = vmatpush.msra.mxu2 %v619_v21  ;;  %773 = vmatpush.msra.mxu3 %v619_v21 }
  0xa3   : > { %v440_v25 = vadd.f32 %v438_v18, %v426_v22  ;;  %v515_v18 = vld [vmem:[%s374_s25 + $0x18] sm:$0xff]  ;;  %v618_v22 = vld [vmem:[%s1184_s8 + $0x70] sm:$0xff]  ;;  %s355_s25 = sand.u32 1, %s922_s10  }
  0xa4   : > { %621 = vmatpush.msra.mxu2 %v618_v22  ;;  %774 = vmatpush.msra.mxu3 %v618_v22 }
  0xa5   : > { %v446_v27 = vadd.f32 %v855_v26, %v440_v25 }
  0xa6   : > { %622 = vmatpush.msra.mxu2 %v617_v23  ;;  %775 = vmatpush.msra.mxu3 %v617_v23 }
  0xa7   : > { %v450_v29 = vsel %vm398_vm0, %v446_v27, 0.0 }
  0xa8   : > { %451 = vadd.xlane.f32.xlu2 %v450_v29  ;;  %623 = vmatpush.msra.mxu2 %v616_v24 }
  0xa9   : > { %776 = vmatpush.msra.mxu3 %v616_v24 }
  0xb0   : > { %448 = vadd.xlane.f32.xlu2 %v447_v31 }
 0x11b   : > { %v452_v39 = vpop.xlane.xlu2 %451 }
 0x11c   : > { %v461_v40 = vmul.f32 %v459_v38, %v452_v39  ;;  %v610_v39 = vld [vmem:[%s1184_s8 + $0x30] sm:$0xff] }
 0x11e   : > { %v463_v41 = vsub.f32 %v446_v27, %v461_v40  ;;  %v615_v27 = vld [vmem:[%s1184_s8 + $0x58] sm:$0xff]  ;;  %v609_v40 = vld [vmem:[%s1184_s8 + $0x28] sm:$0xff] }
 0x11f   : > { %624 = vmatpush.msra.mxu2 %v615_v27  ;;  %777 = vmatpush.msra.mxu3 %v615_v27 }
 0x120   : > { %v465_v42 = vmul.f32 %v463_v41, %v463_v41 }
 0x121   : > { %625 = vmatpush.msra.mxu2 %v614_v28  ;;  %778 = vmatpush.msra.mxu3 %v614_v28 }
 0x122   : > { %v469_v43 = vsel %vm398_vm0, %v465_v42, 0.0  ;;  %v607_v42 = vld [vmem:[%s1184_s8 + $0x18] sm:$0xff] }
 0x123   : > { %470 = vadd.xlane.f32.xlu0 %v469_v43  ;;  %v449_v44 = vpop.xlane.xlu2 %448  ;;  %626 = vmatpush.msra.mxu2 %v613_v36  ;;  %v606_v43 = vld [vmem:[%s1184_s8 + $0x10] sm:$0xff] }
 0x124   : > { %v460_v45 = vmul.f32 %v459_v38, %v449_v44  ;;  %779 = vmatpush.msra.mxu3 %v613_v36  ;;  %v605_v44 = vld [vmem:[%s1184_s8 + $0x8] sm:$0xff] }
 0x125   : > { %627 = vmatpush.msra.mxu2 %v612_v37 }
 0x126   : > { %v462_v46 = vsub.f32 %v445_v30, %v460_v45  ;;  %780 = vmatpush.msra.mxu3 %v612_v37  ;;  %v604_v45 = vld [vmem:[%s1184_s8] sm:$0xff] }
 0x128   : > { %v464_v47 = vmul.f32 %v462_v46, %v462_v46 }
 0x12a   : > { %v466_v48 = vsel %vm398_vm0, %v464_v47, 0.0 }
 0x12b   : > { %467 = vadd.xlane.f32.xlu1 %v466_v48 }
 0x196   : > { %v471_v49 = vpop.xlane.xlu0 %470 }
 0x197   : > { %v473_v50 = vmul.f32 %v471_v49, %v459_v38 }
 0x199   : > { %v475_v51 = vadd.f32 1e-05, %v473_v50 }
 0x19b   : > { %860 = vrsqrt.f32 %v475_v51  ;;  %vm492_vm3 = vweird.f32 %v475_v51 }
 0x19e   : > { %v468_v52 = vpop.xlane.xlu1 %467 }
 0x19f   : > { %v472_v53 = vmul.f32 %v468_v52, %v459_v38  ;;  %v611_v38 = vld [vmem:[%s1184_s8 + $0x38] sm:$0xff] }
 0x1a0   : > { %628 = vmatpush.msra.mxu2 %v611_v38  ;;  %781 = vmatpush.msra.mxu3 %v611_v38 }
 0x1a1   : > { %v861_v54 = vpop.eup %860  ;;  %v474_v55 = vadd.f32 1e-05, %v472_v53 }
 0x1a2   : > { %v487_v56 = vmul.f32 %v861_v54, %v475_v51  ;;  %vm493_vm2 = vweird.f32 %v861_v54  ;;  %629 = vmatpush.msra.mxu2 %v610_v39  ;;  %782 = vmatpush.msra.mxu3 %v610_v39 }
 0x1a3   : > { %862 = vrsqrt.f32 %v474_v55  ;;  %vm494_vm4 = vmor %vm492_vm3, %vm493_vm2  ;;  %vm482_vm6 = vweird.f32 %v474_v55 }
 0x1a4   : > { %v488_v57 = vmul.f32 %v861_v54, %v487_v56  ;;  %630 = vmatpush.msra.mxu2 %v609_v40  ;;  %783 = vmatpush.msra.mxu3 %v609_v40 }
 0x1a6   : > { %v489_v58 = vmul.f32 0.5, %v488_v57 }
 0x1a8   : > { %v490_v59 = vsub.f32 1.5, %v489_v58 }
 0x1a9   : > { %v863_v60 = vpop.eup %862 }
 0x1aa   : > { %v491_v61 = vmul.f32 %v861_v54, %v490_v59  ;;  %v477_v62 = vmul.f32 %v863_v60, %v474_v55  ;;  %vm483_vm5 = vweird.f32 %v863_v60 }
 0x1ab   : > { %vm484_vm7 = vmor %vm482_vm6, %vm483_vm5 }
 0x1ac   : > { %v495_v0 = vsel %vm494_vm4, %v861_v54, %v491_v61  ;;  %v478_v1 = vmul.f32 %v863_v60, %v477_v62 }
 0x1ad   : > { %v497_v3 = vmul.f32 %v495_v0, %v463_v41  ;;  %v608_v41 = vld [vmem:[%s1184_s8 + $0x20] sm:$0xff] }
 0x1ae   : > { %v479_v4 = vmul.f32 0.5, %v478_v1  ;;  %631 = vmatpush.msra.mxu2 %v608_v41  ;;  %784 = vmatpush.msra.mxu3 %v608_v41 }
 0x1af   : > { %v503_v5 = vmul.f32 %v856_v63, %v497_v3 }
 0x1b0   : > { %v480_v6 = vsub.f32 1.5, %v479_v4  ;;  %632 = vmatpush.msra.mxu2 %v607_v42  ;;  %785 = vmatpush.msra.mxu3 %v607_v42 }
 0x1b1   : > { %v509_v7 = vadd.f32 %v857_v2, %v503_v5 }
 0x1b2   : > { %v481_v8 = vmul.f32 %v863_v60, %v480_v6  ;;  %633 = vmatpush.msra.mxu2 %v606_v43  ;;  %786 = vmatpush.msra.mxu3 %v606_v43 }
 0x1b3   : > { %864 = vtanh.f32 %v509_v7 }
 0x1b4   : > { %v485_v9 = vsel %vm484_vm7, %v863_v60, %v481_v8  ;;  %634 = vmatpush.msra.mxu2 %v605_v44  ;;  %787 = vmatpush.msra.mxu3 %v605_v44 }
 0x1b5   : > { %v496_v10 = vmul.f32 %v485_v9, %v462_v46 }
 0x1b6   : > { %635 = vmatpush.msra.mxu2 %v604_v45  ;;  %788 = vmatpush.msra.mxu3 %v604_v45 }
 0x1b7   : > { %v502_v11 = vmul.f32 %v856_v63, %v496_v10 }
 0x1b9   : > { %v1077_v12 = vpop.eup %864  ;;  %v508_v13 = vadd.f32 %v857_v2, %v502_v11 }
 0x1ba   : > { %551 = vmatpush.msrb.mxu0 %v1077_v12  ;;  %771 = vmatpush.msra.mxu1 %v1077_v12 }
 0x1bb   : > { %866 = vtanh.f32 %v508_v13 }
 0x1c1   : > { %v1084_v16 = vpop.eup %866 }
 0x1c2   : > { %552 = vmatpush.msrb.mxu0 %v1084_v16  ;;  %772 = vmatpush.msra.mxu1 %v1084_v16 }
 0x1c3   : > { %759 = vmatmul.msk.f32.vlgmr.msrb.gmra.mxu0 %vm518_vm8, %v512_v14  ;;  %761 = vmatmul.msk.f32.vlgmr.msra.gmra.mxu1 %vm518_vm8, %v514_v15 }
 0x1cb   : > { %760 = vmatmul.msk.f32.gmra.mxu0 %vm518_vm8, %v513_v17  ;;  %762 = vmatmul.msk.f32.gmra.mxu1 %vm518_vm8, %v515_v18 }
 0x1d3   : > { %763 = vmatmul.msk.f32.gmra.mxu1 %vm518_vm8, %v516_v19 }
 0x1db   : > { %764 = vmatmul.msk.f32.gmra.mxu1 %vm518_vm8, %v517_v20 }
 0x240   : > { %v554_v25 = vpop.f32.mrf.mxu0  ;;  %v560_v26 = vpop.f32.mrf.mxu1 }
 0x248   : > { %v557_v29 = vpop.f32.mrf.mxu0  ;;  %v563_v30 = vpop.f32.mrf.mxu1 }
 0x249   : > { %v839_v31 = vpack.i.bf16 %v557_v29, %v554_v25  ;;  %v844_v33 = vpack.i.bf16 %v563_v30, %v560_v26 }
 0x24b   : > { %840 = vrot.lane.b32.xlu2 %v839_v31, %s935_s26  ;;  %s751_s26 = sshll.u32 %s355_s25, 4 }
 0x24c   : > { %s357_s16 = scalar_lea.vmem [#allocation2], %s751_s26 }
 0x24d   : > { %s658_s17 = sshll.u32 %s357_s16, 4  ;;  %s659_s17 = int_to_ptr.vmem [resolvable:$true] %s658_s17 }
 0x250   : > { %v566_v32 = vpop.f32.mrf.mxu1 }
 0x253   : > { %845 = vrot.lane.b32.xlu2 %v844_v33, %s936_s27  ;;  %s770_s27 = sshll.u32 %s1011_s13, 4  ;;  %s646_s13 = scalar_lea.sflag [#allocation3], %s355_s25 }
 0x254   : > { %s657_s14 = scalar_lea.hbm %s1185_s9, %s770_s27  ;;  %s888_s27 = scalar_lea.hbm %s1185_s9, 32 }
 0x255   : > { %s660_s21 = sshll.u32 %s657_s14, 4  ;;  %s661_s21 = int_to_ptr.hbm [resolvable:$true] %s660_s21 }
 0x256   : > { %s882_s22 = sshra.s32 %s661_s21, 4  ;;  %s883_s22 = int_to_ptr.hbm [resolvable:$true] %s882_s22 }
 0x257   : > { %s884_s23 = scalar_lea.hbm %s883_s22, 16  ;;  %p889_p1 = scmp.lt.s32.totalorder %s883_s22, %s1185_s9 }
 0x258   : > { %v569_v34 = vpop.f32.mrf.mxu1  ;;  %p885_p12 = scmp.ne.s32.totalorder %s883_s22, %s884_s23  ;;  %p890_p2 = scmp.lt.s32.totalorder %s888_s27, %s884_s23 }
 0x259   : > { %v849_v35 = vpack.i.bf16 %v569_v34, %v566_v32 }
 0x25a   : > { %p886_p13 = pnand %p885_p12, %p1028_p5  ;;  %p891_p3 = por %p890_p2, %p889_p1 }
 0x25b   : > { %850 = vrot.lane.b32.xlu2 %v849_v35, %s937_s28 }
 0x25c   : > { %p887_p0 = pneg %p886_p13 }
 0x25e   : > { %p892_p4 = pnand %p891_p3, %p887_p0 }
 0x2a5   : > { %v841_v46 = vpop.permute.xlu2 %840 }
 0x2a6   : > { %v843_v48 = vunpack.i.h.bf16 %v841_v46  ;;  %v842_v49 = vunpack.i.l.bf16 %v841_v46 }
 0x2a8   : > { %v596_v55 = vsel %vm398_vm0, %v1084_v16, %v842_v49  ;;  %v597_v56 = vsel %vm398_vm0, %v1077_v12, %v843_v48 }
 0x2ad   : > { %v846_v47 = vpop.permute.xlu2 %845 }
 0x2ae   : > { %v848_v50 = vunpack.i.h.bf16 %v846_v47  ;;  %v847_v51 = vunpack.i.l.bf16 %v846_v47 }
 0x2b0   : > { %v599_v57 = vsel %vm598_vm9, %v596_v55, %v847_v51  ;;  %v600_v58 = vsel %vm598_vm9, %v597_v56, %v848_v50 }
 0x2b5   : > { %v851_v52 = vpop.permute.xlu2 %850 }
 0x2b6   : > { %v853_v53 = vunpack.i.h.bf16 %v851_v52  ;;  %v852_v54 = vunpack.i.l.bf16 %v851_v52 }
 0x2b8   : > { %v602_v59 = vsel %vm601_vm10, %v599_v57, %v852_v54  ;;  %v603_v60 = vsel %vm601_vm10, %v600_v58, %v853_v53 }
 0x2b9   : > { %636 = vmatmul.f32.vlgmr.msra.gmra.mxu2 %v602_v59  ;;  %639 = vmatmul.f32.vlgmr.msra.gmra.mxu3 %v603_v60 }
 0x33c   : > { %v637_v61 = vpop.f32.mrf.mxu2  ;;  %v640_v62 = vpop.f32.mrf.mxu3 }
 0x33d   : > { %v638_v63 = vadd.f32 %v1084_v16, %v637_v61  ;;  %v641_v0 = vadd.f32 %v1077_v12, %v640_v62 }
 0x33f   : > { %643 = vst.msk [vmem:[%s357_s16] sm:$0xff] %vm398_vm0, %v638_v63 }
 0x340   : > { %644 = vst.msk [vmem:[%s357_s16 + $0x8] sm:$0xff] %vm398_vm0, %v641_v0 }
 0x341   : > { %895 = shalt.err (!%p892_p4)
}
 0x342   : > { %s938_s25 = smov 128   ;;  %s939_s14 = smov 8  }
 0x343   : > { %790 = dma.vmem_to_hbm [thread:$0]  (%p1028_p5), %s659_s17, 256, %s661_s21, %s646_s13, %s938_s25, %s938_s25, %s939_s14  }
 0x344 PF: > { %p796_p7 = scmp.ge.s32.totalorder %s930_s12, 2  ;;  %s675_s16 = sand.u32 1, %s918_s30  }
 0x345   : > { %s676_s24 = scalar_lea.sflag [#allocation3], %s675_s16 }
 0x346   : > { %p793_p8 = pnand %p796_p7, %p1032_p6 }
 0x348   : > { %p794_p9 = pneg %p793_p8 }
 0x34a   : > { %913 = dma.done.wait (%p794_p9), %s676_s24, 256  }
 0x34b   : > { %915 = vsyncadd (%p794_p9), %s676_s24, 4294967040  ;;  %p19_p10 = scmp.ge.s32.totalorder %s1015_s15, 4   ;;  %s1188_s30 = smov %s922_s10 }
 0x34c   : > { %s1189_s10 = smov %s926_s11  ;;  %s1190_s11 = smov %s1026_s18 }
 0x34d   : > { %s1191_s12 = smov %s1015_s15  ;;  %21 = sbr.rel (!%p19_p10) target bundleno = 3 (0x3), region = 97 }
 0x352   :  { %682 = vsyncpa [#allocation3], 1 }
 0x353   :  { %684 = vsyncpa [#allocation3 + $0x1], 1 }

</bundles_post_ra>
